<compile_context>
chip_gen: v6e
topology: v6e:2x2x1
jax: 0.10.0
libtpu: 0.0.40
codegen_flags: <defaults>
</compile_context>

<pallas_src>
import functools

import jax
import jax.numpy as jnp
from jax.experimental import pallas as pl
from jax.experimental.pallas import tpu as pltpu

LANE = 128
SUBLANE = 8


def _combined_loss_kernel(x_ref, t_ref, out_ref, bce_acc, inter_acc, denom_acc, *,
                          alpha, smooth, n_valid, block_rows, needs_mask):
    i = pl.program_id(0)
    nsteps = pl.num_programs(0)

    @pl.when(i == 0)
    def _init():
        bce_acc[...] = jnp.zeros_like(bce_acc)
        inter_acc[...] = jnp.zeros_like(inter_acc)
        denom_acc[...] = jnp.zeros_like(denom_acc)

    def vreg_fold(v):
        # (block_rows, 128) -> (8, 128): pure VPU vreg adds, no cross-lane work.
        return jnp.sum(v.reshape(block_rows // SUBLANE, SUBLANE, LANE), axis=0)

    def accumulate(masked):
        x = x_ref[...].astype(jnp.float32)
        t = t_ref[...].astype(jnp.float32)
        if masked:
            # Row-threshold + lane compare for the one partial row: no flat
            # element index, so no int32 overflow for huge inputs.
            full_rows = n_valid // LANE      # rows that are entirely valid
            rem = n_valid % LANE             # valid lanes in the partial row
            row = jax.lax.broadcasted_iota(jnp.int32, (block_rows, LANE), 0)
            lane = jax.lax.broadcasted_iota(jnp.int32, (block_rows, LANE), 1)
            grow = i * block_rows + row
            valid = (grow < full_rows) | ((grow == full_rows) & (lane < rem))
            # Zero inputs first so garbage in the out-of-bounds region can't make NaN/Inf.
            x = jnp.where(valid, x, 0.0)
            t = jnp.where(valid, t, 0.0)

        # Shared transcendental: e = exp(-|x|) serves both sigmoid and stable BCE.
        e = jnp.exp(-jnp.abs(x))
        r = 1.0 / (1.0 + e)
        s = jnp.where(x >= 0.0, r, 1.0 - r)  # sigmoid(x)
        # Numerically stable BCE with logits: max(x,0) - x*t + log(1 + exp(-|x|))
        bce = jnp.maximum(x, 0.0) - x * t + jnp.log1p(e)

        if masked:
            # For masked elements x = t = 0 => s = 0.5, bce = log(2); zero their contributions.
            s = jnp.where(valid, s, 0.0)
            bce = jnp.where(valid, bce, 0.0)

        bce_acc[...] += vreg_fold(bce)        # sum of per-element BCE terms
        inter_acc[...] += vreg_fold(s * t)    # dice intersection
        denom_acc[...] += vreg_fold(s + t)    # dice denominator (sum(s) + sum(t))

    if needs_mask:
        @pl.when(i < nsteps - 1)
        def _unmasked():
            accumulate(False)

        @pl.when(i == nsteps - 1)
        def _masked():
            accumulate(True)
    else:
        accumulate(False)

    @pl.when(i == nsteps - 1)
    def _finalize():
        bce_mean = jnp.sum(bce_acc[...]) / float(n_valid)
        dice = (2.0 * jnp.sum(inter_acc[...]) + smooth) / (jnp.sum(denom_acc[...]) + smooth)
        out_ref[0, 0] = alpha * (1.0 - dice) + (1.0 - alpha) * bce_mean


def combined_loss(inputs, targets, alpha=0.3, smooth=1.0, block_bytes=2 * 1024 * 1024):
    """alpha * DiceLoss + (1 - alpha) * BCEWithLogitsLoss(mean), matching the PyTorch module.

    Inputs are streamed in their native dtype (f32 cast happens in VMEM); pass
    bf16 logits / low-precision targets to halve HBM traffic where acceptable.
    """
    n = int(inputs.size)
    x = inputs.reshape(-1)
    t = targets.reshape(-1)

    # Only pad up to the next lane multiple (<= 127 elems); the in-kernel tail mask
    # guarantees correctness for both this pad and any out-of-bounds rows of the
    # last (possibly partial) block.
    pad = (-n) % LANE
    if pad:
        x = jnp.pad(x, (0, pad))
        t = jnp.pad(t, (0, pad))
    rows = (n + pad) // LANE
    x = x.reshape(rows, LANE)
    t = t.reshape(rows, LANE)

    # Tile size from a per-buffer byte budget (~2 MiB): 4096 rows for f32,
    # 8192 for bf16.  Total input buffering = 2 streams x 2 pipeline buffers
    # x block_bytes ~= 8 MiB, within the default scoped VMEM on v5e/v6e/v7x.
    itemsize = max(jnp.dtype(x.dtype).itemsize, jnp.dtype(t.dtype).itemsize)
    block_rows = max(SUBLANE, (int(block_bytes) // (LANE * itemsize)) // SUBLANE * SUBLANE)
    # Clamp to the (8-rounded) row count for small inputs.
    rows_rounded = ((rows + SUBLANE - 1) // SUBLANE) * SUBLANE
    block_rows = max(SUBLANE, min(block_rows, rows_rounded))
    grid = pl.cdiv(rows, block_rows)
    needs_mask = (grid * block_rows * LANE) != n

    kernel = functools.partial(
        _combined_loss_kernel,
        alpha=float(alpha),
        smooth=float(smooth),
        n_valid=n,
        block_rows=block_rows,
        needs_mask=bool(needs_mask),
    )

    out = pl.pallas_call(
        kernel,
        out_shape=jax.ShapeDtypeStruct((1, 1), jnp.float32),
        grid_spec=pltpu.PrefetchScalarGridSpec(
            num_scalar_prefetch=0,
            grid=(grid,),
            in_specs=[
                pl.BlockSpec((block_rows, LANE), lambda i: (i, 0)),
                pl.BlockSpec((block_rows, LANE), lambda i: (i, 0)),
            ],
            out_specs=pl.BlockSpec(memory_space=pltpu.MemorySpace.SMEM),
            scratch_shapes=[
                pltpu.VMEM((SUBLANE, LANE), jnp.float32),  # sum(bce)
                pltpu.VMEM((SUBLANE, LANE), jnp.float32),  # sum(sigmoid(x) * t)
                pltpu.VMEM((SUBLANE, LANE), jnp.float32),  # sum(sigmoid(x)) + sum(t)
            ],
        ),
        compiler_params=pltpu.CompilerParams(dimension_semantics=("arbitrary",)),
    )(x, t)
    return out[0, 0]


def _reference_combined_loss(inputs, targets, alpha=0.3, smooth=1.0):
    x = inputs.astype(jnp.float32).reshape(-1)
    t = targets.astype(jnp.float32).reshape(-1)
    bce = jnp.mean(jnp.maximum(x, 0.0) - x * t + jnp.log1p(jnp.exp(-jnp.abs(x))))
    s = jax.nn.sigmoid(x)
    inter = jnp.sum(s * t)
    dice = (2.0 * inter + smooth) / (jnp.sum(s) + jnp.sum(t) + smooth)
    return alpha * (1.0 - dice) + (1.0 - alpha) * bce


if __name__ == "__main__":
    key = jax.random.PRNGKey(0)
    k1, k2 = jax.random.split(key)
    # Logits and binary targets, NCHW like the PyTorch module would receive.
    x = jax.random.normal(k1, (2, 4, 16, 16), dtype=jnp.float32)
    t = jax.random.bernoulli(k2, 0.5, (2, 4, 16, 16)).astype(jnp.float32)

    loss = combined_loss(x, t)
    jax.block_until_ready(loss)

    ref = _reference_combined_loss(x, t)
    assert jnp.allclose(loss, ref, rtol=1e-5, atol=1e-5), (loss, ref)

    # Exercise the ragged-tail (in-kernel mask) path with a non-128-multiple size.
    k3, k4 = jax.random.split(k1)
    x2 = jax.random.normal(k3, (3, 5, 7, 11), dtype=jnp.float32)
    t2 = jax.random.bernoulli(k4, 0.5, (3, 5, 7, 11)).astype(jnp.float32)
    loss2 = combined_loss(x2, t2)
    jax.block_until_ready(loss2)
    ref2 = _reference_combined_loss(x2, t2)
    assert jnp.allclose(loss2, ref2, rtol=1e-5, atol=1e-5), (loss2, ref2)

    # Exercise the multi-step grid + tail-mask path with a larger ragged input.
    k5, k6 = jax.random.split(k2)
    x3 = jax.random.normal(k5, (1, 3, 301, 173), dtype=jnp.float32)
    t3 = jax.random.bernoulli(k6, 0.5, (1, 3, 301, 173)).astype(jnp.float32)
    loss3 = combined_loss(x3, t3, block_bytes=64 * 1024)  # force several grid steps
    jax.block_until_ready(loss3)
    ref3 = _reference_combined_loss(x3, t3)
    assert jnp.allclose(loss3, ref3, rtol=1e-5, atol=1e-5), (loss3, ref3)

    print("KERNEL_OK")
</pallas_src>

<mosaic_0001>
module attributes {stable_mosaic.version = 11 : i64} {
  func.func @_combined_loss_kernel(%arg0: i32, %arg1: memref<16x128xf32, #tpu.memory_space<vmem>>, %arg2: memref<16x128xf32, #tpu.memory_space<vmem>>, %arg3: memref<1x1xf32, #tpu.memory_space<smem>>, %arg4: memref<8x128xf32, #tpu.memory_space<vmem>>, %arg5: memref<8x128xf32, #tpu.memory_space<vmem>>, %arg6: memref<8x128xf32, #tpu.memory_space<vmem>>) attributes {dimension_semantics = [#tpu.dimension_semantics<arbitrary>], iteration_bounds = array<i64: 1>, scalar_prefetch = 0 : i64, scratch_operands = 3 : i64, tpu.core_type = #tpu.core_type<tc>, window_params = [{transform_indices = @transform_0, window_bounds = array<i64: 16, 128>}, {transform_indices = @transform_1, window_bounds = array<i64: 16, 128>}, {transform_indices = @transform_2, window_bounds = array<i64: 1, 1>}]} {
    %c0_i32 = arith.constant 0 : i32
    %0 = arith.cmpi eq, %arg0, %c0_i32 : i32
    %1 = arith.extui %0 : i1 to i32
    %c0_i32_0 = arith.constant 0 : i32
    %2 = arith.cmpi ne, %1, %c0_i32_0 : i32
    scf.if %2 {
      %cst_26 = arith.constant 0.000000e+00 : f32
      %44 = vector.broadcast %cst_26 : f32 to vector<8x128xf32>
      %c0_27 = arith.constant 0 : index
      %c0_28 = arith.constant 0 : index
      %45 = vector.load %arg4[%c0_27, %c0_28] : memref<8x128xf32, #tpu.memory_space<vmem>>, vector<8x128xf32>
      tpu.vector_store %arg4[%c0_27, %c0_28], %44 {strides = array<i32>} : memref<8x128xf32, #tpu.memory_space<vmem>>, vector<8x128xf32>,
      %cst_29 = arith.constant 0.000000e+00 : f32
      %46 = vector.broadcast %cst_29 : f32 to vector<8x128xf32>
      %c0_30 = arith.constant 0 : index
      %c0_31 = arith.constant 0 : index
      %47 = vector.load %arg5[%c0_30, %c0_31] : memref<8x128xf32, #tpu.memory_space<vmem>>, vector<8x128xf32>
      tpu.vector_store %arg5[%c0_30, %c0_31], %46 {strides = array<i32>} : memref<8x128xf32, #tpu.memory_space<vmem>>, vector<8x128xf32>,
      %cst_32 = arith.constant 0.000000e+00 : f32
      %48 = vector.broadcast %cst_32 : f32 to vector<8x128xf32>
      %c0_33 = arith.constant 0 : index
      %c0_34 = arith.constant 0 : index
      %49 = vector.load %arg6[%c0_33, %c0_34] : memref<8x128xf32, #tpu.memory_space<vmem>>, vector<8x128xf32>
      tpu.vector_store %arg6[%c0_33, %c0_34], %48 {strides = array<i32>} : memref<8x128xf32, #tpu.memory_space<vmem>>, vector<8x128xf32>,
    } else {
    }
    %c0 = arith.constant 0 : index
    %c0_1 = arith.constant 0 : index
    %3 = vector.load %arg1[%c0, %c0_1] : memref<16x128xf32, #tpu.memory_space<vmem>>, vector<16x128xf32>
    %c0_2 = arith.constant 0 : index
    %c0_3 = arith.constant 0 : index
    %4 = vector.load %arg2[%c0_2, %c0_3] : memref<16x128xf32, #tpu.memory_space<vmem>>, vector<16x128xf32>
    %5 = math.absf %3 : vector<16x128xf32>
    %cst = arith.constant 0.000000e+00 : f32
    %6 = vector.broadcast %cst : f32 to vector<16x128xf32>
    %7 = arith.subf %6, %5 : vector<16x128xf32>
    %8 = math.exp %7 : vector<16x128xf32>
    %cst_4 = arith.constant 1.000000e+00 : f32
    %9 = vector.broadcast %cst_4 : f32 to vector<16x128xf32>
    %10 = arith.addf %9, %8 : vector<16x128xf32>
    %cst_5 = arith.constant 1.000000e+00 : f32
    %11 = vector.broadcast %cst_5 : f32 to vector<16x128xf32>
    %12 = arith.divf %11, %10 : vector<16x128xf32>
    %cst_6 = arith.constant 0.000000e+00 : f32
    %13 = vector.broadcast %cst_6 : f32 to vector<16x128xf32>
    %14 = arith.cmpf oge, %3, %13 : vector<16x128xf32>
    %cst_7 = arith.constant 1.000000e+00 : f32
    %15 = vector.broadcast %cst_7 : f32 to vector<16x128xf32>
    %16 = arith.subf %15, %12 : vector<16x128xf32>
    %17 = arith.select %14, %12, %16 : vector<16x128xi1>, vector<16x128xf32>
    %cst_8 = arith.constant 0.000000e+00 : f32
    %18 = vector.broadcast %cst_8 : f32 to vector<16x128xf32>
    %19 = arith.maximumf %3, %18 : vector<16x128xf32>
    %20 = arith.mulf %3, %4 : vector<16x128xf32>
    %21 = arith.subf %19, %20 : vector<16x128xf32>
    %22 = math.log1p %8 : vector<16x128xf32>
    %23 = arith.addf %21, %22 : vector<16x128xf32>
    %c0_9 = arith.constant 0 : index
    %c0_10 = arith.constant 0 : index
    %24 = vector.load %arg4[%c0_9, %c0_10] : memref<8x128xf32, #tpu.memory_space<vmem>>, vector<8x128xf32>
    %25 = vector.shape_cast %23 : vector<16x128xf32> to vector<2x8x128xf32>
    %cst_11 = arith.constant dense<0.000000e+00> : vector<8x128xf32>
    %26 = vector.multi_reduction <add>, %25, %cst_11 [0] : vector<2x8x128xf32> to vector<8x128xf32>
    %27 = arith.addf %24, %26 : vector<8x128xf32>
    %c0_12 = arith.constant 0 : index
    %c0_13 = arith.constant 0 : index
    %28 = vector.load %arg4[%c0_12, %c0_13] : memref<8x128xf32, #tpu.memory_space<vmem>>, vector<8x128xf32>
    tpu.vector_store %arg4[%c0_12, %c0_13], %27 {strides = array<i32>} : memref<8x128xf32, #tpu.memory_space<vmem>>, vector<8x128xf32>,
    %c0_14 = arith.constant 0 : index
    %c0_15 = arith.constant 0 : index
    %29 = vector.load %arg5[%c0_14, %c0_15] : memref<8x128xf32, #tpu.memory_space<vmem>>, vector<8x128xf32>
    %30 = arith.mulf %17, %4 : vector<16x128xf32>
    %31 = vector.shape_cast %30 : vector<16x128xf32> to vector<2x8x128xf32>
    %cst_16 = arith.constant dense<0.000000e+00> : vector<8x128xf32>
    %32 = vector.multi_reduction <add>, %31, %cst_16 [0] : vector<2x8x128xf32> to vector<8x128xf32>
    %33 = arith.addf %29, %32 : vector<8x128xf32>
    %c0_17 = arith.constant 0 : index
    %c0_18 = arith.constant 0 : index
    %34 = vector.load %arg5[%c0_17, %c0_18] : memref<8x128xf32, #tpu.memory_space<vmem>>, vector<8x128xf32>
    tpu.vector_store %arg5[%c0_17, %c0_18], %33 {strides = array<i32>} : memref<8x128xf32, #tpu.memory_space<vmem>>, vector<8x128xf32>,
    %c0_19 = arith.constant 0 : index
    %c0_20 = arith.constant 0 : index
    %35 = vector.load %arg6[%c0_19, %c0_20] : memref<8x128xf32, #tpu.memory_space<vmem>>, vector<8x128xf32>
    %36 = arith.addf %17, %4 : vector<16x128xf32>
    %37 = vector.shape_cast %36 : vector<16x128xf32> to vector<2x8x128xf32>
    %cst_21 = arith.constant dense<0.000000e+00> : vector<8x128xf32>
    %38 = vector.multi_reduction <add>, %37, %cst_21 [0] : vector<2x8x128xf32> to vector<8x128xf32>
    %39 = arith.addf %35, %38 : vector<8x128xf32>
    %c0_22 = arith.constant 0 : index
    %c0_23 = arith.constant 0 : index
    %40 = vector.load %arg6[%c0_22, %c0_23] : memref<8x128xf32, #tpu.memory_space<vmem>>, vector<8x128xf32>
    tpu.vector_store %arg6[%c0_22, %c0_23], %39 {strides = array<i32>} : memref<8x128xf32, #tpu.memory_space<vmem>>, vector<8x128xf32>,
    %c0_i32_24 = arith.constant 0 : i32
    %41 = arith.cmpi eq, %arg0, %c0_i32_24 : i32
    %42 = arith.extui %41 : i1 to i32
    %c0_i32_25 = arith.constant 0 : i32
    %43 = arith.cmpi ne, %42, %c0_i32_25 : i32
    scf.if %43 {
      %c0_26 = arith.constant 0 : index
      %c0_27 = arith.constant 0 : index
      %44 = vector.load %arg4[%c0_26, %c0_27] : memref<8x128xf32, #tpu.memory_space<vmem>>, vector<8x128xf32>
      %45 = vector.shape_cast %44 : vector<8x128xf32> to vector<1x8x128xf32>
      %cst_28 = arith.constant dense<0.000000e+00> : vector<1xf32>
      %46 = vector.multi_reduction <add>, %45, %cst_28 [1, 2] : vector<1x8x128xf32> to vector<1xf32>
      %47 = vector.shape_cast %46 : vector<1xf32> to vector<1x1x1xf32>
      %48 = vector.extract %47[0, 0, 0] : f32 from vector<1x1x1xf32>
      %cst_29 = arith.constant 2.048000e+03 : f32
      %49 = arith.divf %48, %cst_29 : f32
      %c0_30 = arith.constant 0 : index
      %c0_31 = arith.constant 0 : index
      %50 = vector.load %arg5[%c0_30, %c0_31] : memref<8x128xf32, #tpu.memory_space<vmem>>, vector<8x128xf32>
      %51 = vector.shape_cast %50 : vector<8x128xf32> to vector<1x8x128xf32>
      %cst_32 = arith.constant dense<0.000000e+00> : vector<1xf32>
      %52 = vector.multi_reduction <add>, %51, %cst_32 [1, 2] : vector<1x8x128xf32> to vector<1xf32>
      %53 = vector.shape_cast %52 : vector<1xf32> to vector<1x1x1xf32>
      %54 = vector.extract %53[0, 0, 0] : f32 from vector<1x1x1xf32>
      %cst_33 = arith.constant 2.000000e+00 : f32
      %55 = arith.mulf %cst_33, %54 : f32
      %cst_34 = arith.constant 1.000000e+00 : f32
      %56 = arith.addf %55, %cst_34 : f32
      %c0_35 = arith.constant 0 : index
      %c0_36 = arith.constant 0 : index
      %57 = vector.load %arg6[%c0_35, %c0_36] : memref<8x128xf32, #tpu.memory_space<vmem>>, vector<8x128xf32>
      %58 = vector.shape_cast %57 : vector<8x128xf32> to vector<1x8x128xf32>
      %cst_37 = arith.constant dense<0.000000e+00> : vector<1xf32>
      %59 = vector.multi_reduction <add>, %58, %cst_37 [1, 2] : vector<1x8x128xf32> to vector<1xf32>
      %60 = vector.shape_cast %59 : vector<1xf32> to vector<1x1x1xf32>
      %61 = vector.extract %60[0, 0, 0] : f32 from vector<1x1x1xf32>
      %cst_38 = arith.constant 1.000000e+00 : f32
      %62 = arith.addf %61, %cst_38 : f32
      %63 = arith.divf %56, %62 : f32
      %cst_39 = arith.constant 1.000000e+00 : f32
      %64 = arith.subf %cst_39, %63 : f32
      %cst_40 = arith.constant 3.000000e-01 : f32
      %65 = arith.mulf %cst_40, %64 : f32
      %cst_41 = arith.constant 0.699999988 : f32
      %66 = arith.mulf %cst_41, %49 : f32
      %67 = arith.addf %65, %66 : f32
      %c0_42 = arith.constant 0 : index
      %c0_43 = arith.constant 0 : index
      %68 = memref.load %arg3[%c0_42, %c0_43] : memref<1x1xf32, #tpu.memory_space<smem>>
      memref.store %67, %arg3[%c0_42, %c0_43] : memref<1x1xf32, #tpu.memory_space<smem>>
    } else {
    }
    return
  }
  func.func @transform_0(%arg0: i32) -> (i32, i32) {
    %c0_i32 = arith.constant 0 : i32
    %c0_i32_0 = arith.constant 0 : i32
    return %arg0, %c0_i32 : i32, i32
  }
  func.func @transform_1(%arg0: i32) -> (i32, i32) {
    %c0_i32 = arith.constant 0 : i32
    %c0_i32_0 = arith.constant 0 : i32
    return %arg0, %c0_i32 : i32, i32
  }
  func.func @transform_2(%arg0: i32) -> (i32, i32) {
    %c0_i32 = arith.constant 0 : i32
    %c0_i32_0 = arith.constant 0 : i32
    %c0_i32_1 = arith.constant 0 : i32
    return %c0_i32, %c0_i32_0 : i32, i32
  }
}

</mosaic_0001>

<bundles_post_ra>
// kernel: tpu_custom_call.1
= control target key start
LH: loop header
LB: loop body
LE: loop exit
PB: predicated region body
PF: predicated region fallthrough
CT: control target
= control target key end

     0   :  { %7 = vsyncpa [#allocation6], 0  ;;  %s287_s0 = inlined_call_operand.hbm [shape: f32[16,128], index: 0, kind: input, shape index: {}]   ;;  %s288_s1 = inlined_call_operand.hbm [shape: f32[16,128], index: 1, kind: input, shape index: {}]   ;;  %s289_s2 = inlined_call_operand.hbm [shape: f32[1,1], index: 2, kind: output, shape index: {}]  }
   0x1   :  { %8 = vsyncpa [#allocation9], 0 }
   0x2   :  { %9 = vsyncpa [#allocation7], 0  ;;  %s258_s9 = smov [#allocation5]  }
   0x3   :  { %s15_s10 = sshll.u32 %s258_s9, 4  ;;  %s16_s10 = int_to_ptr.vmem [resolvable:$true] %s15_s10 }
   0x4   :  { %s212_s11 = scalar_lea.vmem %s16_s10, 256  ;;  %p217_p1 = scmp.lt.s32.totalorder %s16_s10, %s16_s10 }
   0x5   :  { %p213_p0 = scmp.ne.s32.totalorder %s16_s10, %s212_s11  ;;  %p218_p2 = scmp.lt.s32.totalorder %s212_s11, %s212_s11 }
   0x7   :  { %p219_p3 = por %p218_p2, %p217_p1 }
   0x9   :  { %p220_p4 = pnand %p219_p3, %p213_p0 }
   0xb   :  { %223 = shalt.err (!%p220_p4)
}
   0xc   :  { %s259_s12 = smov 128   ;;  %s260_s13 = smov 8  }
   0xd   :  { %21 = dma.hbm_to_vmem [thread:$0]  %s287_s0, 256, %s16_s10, [#allocation6], %s259_s12, %s259_s12, %s260_s13  }
   0xe   :  { %s261_s16 = smov [#allocation8]  }
   0xf   :  { %s27_s17 = sshll.u32 %s261_s16, 4  ;;  %s28_s17 = int_to_ptr.vmem [resolvable:$true] %s27_s17 }
  0x10   :  { %s232_s18 = scalar_lea.vmem %s28_s17, 256  ;;  %p237_p6 = scmp.lt.s32.totalorder %s28_s17, %s28_s17 }
  0x11   :  { %p233_p5 = scmp.ne.s32.totalorder %s28_s17, %s232_s18  ;;  %p238_p7 = scmp.lt.s32.totalorder %s232_s18, %s232_s18 }
  0x13   :  { %p239_p8 = por %p238_p7, %p237_p6 }
  0x15   :  { %p240_p9 = pnand %p239_p8, %p233_p5 }
  0x17   :  { %243 = shalt.err (!%p240_p9)
}
  0x18   :  { %33 = dma.hbm_to_vmem [thread:$0]  %s288_s1, 256, %s28_s17, [#allocation9], %s259_s12, %s259_s12, %s260_s13  }
  0x19   :  { %252 = dma.done.wait [#allocation6], 256  }
  0x1a   :  { %253 = vsyncadd [#allocation6], 4294967040 }
  0x1b   :  { %254 = dma.done.wait [#allocation9], 256  }
  0x1c   :  { %255 = vsyncadd [#allocation9], 4294967040  ;;  %v47_v0 = vld [vmem:[#allocation5] sm:$0xff]  ;;  %v48_v1 = vld [vmem:[#allocation5 + $0x8] sm:$0xff]  ;;  %s262_s4 = smov [#allocation10]  }
  0x1d   :  { %v51_v2 = vand.u32 2147483647, %v47_v0  ;;  %v52_v3 = vand.u32 2147483647, %v48_v1  ;;  %v49_v13 = vld [vmem:[#allocation8] sm:$0xff]  ;;  %v50_v15 = vld [vmem:[#allocation8 + $0x8] sm:$0xff] }
  0x1e   :  { %v71_v17 = vmax.f32 %v47_v0, 0.0  ;;  %v73_v18 = vmul.f32 %v49_v13, %v47_v0  ;;  %v72_v21 = vmax.f32 %v48_v1, 0.0  ;;  %v74_v22 = vmul.f32 %v50_v15, %v48_v1 }
  0x1f   :  { %v53_v4 = vsub.f32 0.0, %v51_v2  ;;  %v54_v5 = vsub.f32 0.0, %v52_v3  ;;  %vm66_vm1 = vcmp.ge.f32.partialorder %v48_v1, 0.0  ;;  %vm65_vm3 = vcmp.ge.f32.partialorder %v47_v0, 0.0 }
  0x20   :  { %v75_v26 = vsub.f32 %v71_v17, %v73_v18  ;;  %v76_v31 = vsub.f32 %v72_v21, %v74_v22 }
  0x21   :  { %v55_v6 = vmul.f32 1.442695, %v53_v4  ;;  %v57_v7 = vmul.f32 1.442695, %v54_v5 }
  0x23   :  { %190 = vpow2.f32 %v55_v6 }
  0x24   :  { %192 = vpow2.f32 %v57_v7 }
  0x30   :  { %v191_v8 = vpop.eup %190 }
  0x31   :  { %v193_v9 = vpop.eup %192  ;;  %v59_v10 = vadd.f32 1.0, %v191_v8  ;;  %v80_v12 = vmul.f32 -0.5, %v191_v8  ;;  %v83_v19 = vand.u32 2147483647, %v191_v8 }
  0x32   :  { %v60_v11 = vadd.f32 1.0, %v193_v9  ;;  %v89_v14 = vmul.f32 -0.5, %v193_v9  ;;  %v92_v23 = vand.u32 2147483647, %v193_v9 }
  0x33   :  { %194 = vlog2.f32 %v59_v10  ;;  %v81_v16 = vadd.f32 1.0, %v80_v12  ;;  %vm84_vm0 = vcmp.lt.f32.partialorder %v83_v19, 0.0004427343 }
  0x34   :  { %196 = vrcp.f32 %v60_v11  ;;  %v90_v20 = vadd.f32 1.0, %v89_v14  ;;  %vm93_vm2 = vcmp.lt.f32.partialorder %v92_v23, 0.0004427343 }
  0x35   :  { %198 = vlog2.f32 %v60_v11  ;;  %v82_v24 = vmul.f32 %v191_v8, %v81_v16 }
  0x36   :  { %200 = vrcp.f32 %v59_v10  ;;  %v91_v29 = vmul.f32 %v193_v9, %v90_v20 }
  0x40   :  { %v195_v25 = vpop.eup %194 }
  0x41   :  { %v197_v27 = vpop.eup %196  ;;  %v79_v28 = vmul.f32 0.6931472, %v195_v25 }
  0x42   :  { %v199_v30 = vpop.eup %198  ;;  %v68_v32 = vsub.f32 1.0, %v197_v27 }
  0x43   :  { %v201_v33 = vpop.eup %200  ;;  %v85_v34 = vsel %vm84_vm0, %v82_v24, %v79_v28  ;;  %v88_v35 = vmul.f32 0.6931472, %v199_v30 }
  0x44   :  { %v95_v36 = vadd.f32 %v85_v34, %v75_v26  ;;  %v67_v37 = vsub.f32 1.0, %v201_v33  ;;  %v70_v38 = vsel %vm66_vm1, %v197_v27, %v68_v32 }
  0x45   :  { %v94_v39 = vsel %vm93_vm2, %v91_v29, %v88_v35  ;;  %v109_v40 = vadd.f32 %v70_v38, %v50_v15  ;;  %v103_v43 = vmul.f32 %v70_v38, %v50_v15 }
  0x46   :  { %v96_v41 = vadd.f32 %v94_v39, %v76_v31  ;;  %v69_v42 = vsel %vm65_vm3, %v201_v33, %v67_v37 }
  0x47   :  { %v108_v44 = vadd.f32 %v69_v42, %v49_v13  ;;  %v102_v45 = vmul.f32 %v69_v42, %v49_v13 }
  0x48   :  { %v98_v46 = vadd.f32 %v96_v41, %v95_v36 }
  0x49   :  { %v110_v47 = vadd.f32 %v109_v40, %v108_v44  ;;  %v104_v48 = vadd.f32 %v103_v43, %v102_v45 }
  0x4a   :  { %117 = vadd.xlane.f32.xlu0 %v98_v46 }
  0x4b   :  { %142 = vadd.xlane.f32.xlu1 %v110_v47 }
  0x4e   :  { %130 = vadd.xlane.f32.xlu0 %v104_v48 }
  0xd3   :  { %v118_v49 = vpop.xlane.xlu0 %117 }
  0xd4   :  { %v119_v50 = vrot.slane %v118_v49, 4  ;;  %v143_v51 = vpop.xlane.xlu1 %142 }
  0xd5   :  { %v144_v52 = vrot.slane %v143_v51, 4 }
  0xd6   :  { %v120_v53 = vadd.f32 %v119_v50, %v118_v49 }
  0xd7   :  { %v145_v54 = vadd.f32 %v144_v52, %v143_v51  ;;  %v131_v55 = vpop.xlane.xlu0 %130 }
  0xd8   :  { %v121_v56 = vrot.slane %v120_v53, 2  ;;  %v132_v57 = vrot.slane %v131_v55, 4 }
  0xd9   :  { %v146_v58 = vrot.slane %v145_v54, 2 }
  0xda   :  { %v133_v59 = vadd.f32 %v132_v57, %v131_v55  ;;  %v122_v60 = vadd.f32 %v121_v56, %v120_v53 }
  0xdb   :  { %v147_v61 = vadd.f32 %v146_v58, %v145_v54 }
  0xdc   :  { %v134_v62 = vrot.slane %v133_v59, 2  ;;  %v123_v63 = vrot.slane %v122_v60, 1 }
  0xdd   :  { %v148_v2 = vrot.slane %v147_v61, 1 }
  0xde   :  { %v135_v0 = vadd.f32 %v134_v62, %v133_v59  ;;  %v124_v1 = vadd.f32 %v123_v63, %v122_v60 }
  0xdf   :  { %v149_v5 = vadd.f32 %v148_v2, %v147_v61 }
  0xe0   :  { %177 = vpush %v124_v1  ;;  %v136_v3 = vrot.slane %v135_v0, 1 }
  0xe2   :  { %v137_v4 = vadd.f32 %v136_v3, %v135_v0 }
  0xe4   :  { %179 = vpush %v137_v4 }
  0xe5   :  { %181 = vpush %v149_v5 }
 0x111   :  { %s178_s0 = spop %177 }
 0x112   :  { %s128_s25 = smul.f32 0.00048828125, %s178_s0 }
 0x114   :  { %s158_s29 = smul.f32 0.7, %s128_s25 }
 0x115   :  { %s180_s1 = spop %179 }
 0x116   :  { %s182_s21 = spop %181  ;;  %s139_s23 = smul.f32 2.0, %s180_s1 }
 0x117   :  { %s151_s22 = sadd.f32 1.0, %s182_s21 }
 0x118   :  { %s140_s24 = sadd.f32 1.0, %s139_s23 }
 0x119   :  { %v152_v6 = vstv %s151_s22 }
 0x11a   :  { %202 = vrcp.f32 %v152_v6 }
 0x127   :  { %v203_v7 = vpop.eup %202 }
 0x128   :  { %183 = vpush %v203_v7 }
 0x159   :  { %s184_s26 = spop %183 }
 0x15a   :  { %s155_s27 = smul.f32 %s184_s26, %s140_s24 }
 0x15c   :  { %s156_s28 = ssub.f32 1.0, %s155_s27 }
 0x15e   :  { %s157_s30 = smul.f32 0.3, %s156_s28 }
 0x160   :  { %s159_s3 = sadd.f32 %s158_s29, %s157_s30 }
 0x162   :  { %161 = sst [smem:[#allocation10]] %s159_s3 }
 0x163   :  { %169 = dma.smem_to_hbm %s262_s4, 16, %s289_s2, [#allocation7]  }
 0x164   :  { %256 = dma.done.wait [#allocation7], 16  }
 0x165   :  { %257 = vsyncadd [#allocation7], 4294967280 }
 0x166   :  { %173 = sfence }
 0x167   :  { %174 = vsyncpa [#allocation6], 1 }
 0x168   :  { %175 = vsyncpa [#allocation9], 1 }
 0x169   :  { %176 = vsyncpa [#allocation7], 1 }

</bundles_post_ra>
